<compile_context>
chip_gen: v7x
topology: tpu7x:2x2x1
jax: 0.10.0
libtpu: 0.0.40
codegen_flags: <defaults>
</compile_context>

<pallas_src>
import functools

import jax
import jax.numpy as jnp
from jax.experimental import pallas as pl
from jax.experimental.pallas import tpu as pltpu


_SUBLANE = 8


def _round_up(a, b):
    return ((a + b - 1) // b) * b


def _attention_kernel(x_ref, w_ref, u_ref, o_ref, *, cast_mxu_bf16):
    # x_ref: (TM, D) input dtype; w_ref: (D, D); u_ref: (1, D) f32.
    x = x_ref[...]

    # MXU matmul with f32 accumulation.  Optionally feed bf16 operands
    # (native MXU rate on all generations) when the wrapper decided D is
    # large enough for the MXU to matter.
    if cast_mxu_bf16:
        scores = jnp.dot(x.astype(jnp.bfloat16), w_ref[...],
                         preferred_element_type=jnp.float32)
    else:
        scores = jnp.dot(x, w_ref[...], preferred_element_type=jnp.float32)
    scores = scores + u_ref[...]

    # Numerically stable softmax over the feature axis (f32).
    m = jnp.max(scores, axis=-1, keepdims=True)
    e = jnp.exp(scores - m)
    denom = jnp.sum(e, axis=-1, keepdims=True)
    # One value per row; approx reciprocal runs on the EUP slot (VALU stays free).
    attn = e * pl.reciprocal(denom, approx=True)

    # Elementwise gate of the input.
    if x.dtype == jnp.float32:
        o_ref[...] = (attn * x).astype(o_ref.dtype)
    else:
        # bf16-native VPU gate on v6e/v7x: avoid upcasting the whole x tile.
        o_ref[...] = (attn.astype(x.dtype) * x).astype(o_ref.dtype)


def _vmem_capacity_bytes():
    try:
        info = pltpu.get_tpu_info()
        return int(getattr(info, "vmem_capacity_bytes", 64 * 1024 * 1024))
    except Exception:
        return 64 * 1024 * 1024


def attention_forward(x, w, u, batch_size, time_steps, *,
                      tile_rows=None, vmem_budget_bytes=None,
                      cast_mxu_bf16=None):
    """x: [B, T, D], w: [D, D], u: [D] -> [B, T, D]."""
    D = w.shape[0]
    x_flat = x.reshape(-1, D)
    n_rows = x_flat.shape[0]

    in_bytes = jnp.dtype(x.dtype).itemsize
    # Sublane packing: 8 rows/vreg for 32-bit, 16 for bf16, 32 for int8/fp8.
    row_align = _SUBLANE * max(1, 4 // in_bytes)

    # bf16 MXU operands only help once the MXU competes with HBM (~D >= 2k);
    # at the default it keeps f32 matmul numerics exact for f32 inputs.
    if cast_mxu_bf16 is None:
        cast_mxu_bf16 = (x.dtype == jnp.float32) and D >= 2048
    w_in = w.astype(jnp.bfloat16) if (cast_mxu_bf16 and
                                      w.dtype == jnp.float32) else w
    w_bytes = jnp.dtype(w_in.dtype).itemsize
    u_2d = u.reshape(1, D).astype(jnp.float32)

    # Per-generation VMEM budget: ~half of physical (64 MiB on v5e/v6e,
    # 32 MiB on v7x), capped at 96 MiB.
    if vmem_budget_bytes is None:
        vmem_budget_bytes = min(_vmem_capacity_bytes() // 2, 96 * 1024 * 1024)

    # W / u are constant blocks (index_map always (0,0)); once W is large,
    # single-buffer them to reclaim VMEM (big win on v7x's 64 MiB).
    single_buffer_consts = D * D * w_bytes >= (4 << 20)
    const_bufs = 1 if single_buffer_consts else 2

    fixed = const_bufs * (D * D * w_bytes + D * 4)
    per_row = 2 * D * (in_bytes + in_bytes)  # double-buffered x tile + out tile

    if fixed + row_align * per_row > vmem_budget_bytes:
        # TODO(synk): add a flash-style column-tiled (online softmax over W
        # column tiles) fallback for D too large for a resident W block.
        raise ValueError(
            f"input_dim={D}: resident W needs {fixed / 1e6:.1f} MB which does "
            f"not fit the {vmem_budget_bytes / 1e6:.1f} MB VMEM budget of this "
            "TPU generation.")

    if tile_rows is None:
        # Biggest row tile that fits the budget, aligned to the sublane
        # packing, capped at 1024 rows, and kept small enough that the grid
        # retains ~8 steps (keeps the DMA pipeline and both v7x cores fed).
        avail = max(vmem_budget_bytes - fixed, per_row * row_align)
        tile_rows = max(row_align,
                        min(1024, (avail // per_row) // row_align * row_align))
        cap_for_steps = max(row_align,
                            _round_up(pl.cdiv(n_rows, 8), row_align))
        tile_rows = min(tile_rows, cap_for_steps)
    assert tile_rows % _SUBLANE == 0

    # No row padding: Pallas handles the partial last block (masked writeback).
    grid = (pl.cdiv(n_rows, tile_rows),)

    footprint = fixed + tile_rows * per_row
    vmem_limit = int(min(max(footprint + 4 * 1024 * 1024, 16 * 1024 * 1024),
                         _vmem_capacity_bytes()))

    const_kwargs = ({"pipeline_mode": pl.Buffered(1)}
                    if single_buffer_consts else {})

    kernel = functools.partial(_attention_kernel, cast_mxu_bf16=cast_mxu_bf16)

    out_flat = pl.pallas_call(
        kernel,
        out_shape=jax.ShapeDtypeStruct((n_rows, D), x.dtype),
        grid=grid,
        in_specs=[
            pl.BlockSpec((tile_rows, D), lambda i: (i, 0)),           # x row tile
            pl.BlockSpec((D, D), lambda i: (0, 0), **const_kwargs),   # W (constant)
            pl.BlockSpec((1, D), lambda i: (0, 0), **const_kwargs),   # bias (constant)
        ],
        out_specs=pl.BlockSpec((tile_rows, D), lambda i: (i, 0)),
        compiler_params=pltpu.CompilerParams(
            dimension_semantics=("parallel",),  # row axis sharded across cores
            vmem_limit_bytes=vmem_limit,
        ),
    )(x_flat, w_in, u_2d)

    return out_flat.reshape(batch_size, time_steps, D)


def _reference(x, w, u, batch_size, time_steps):
    D = w.shape[0]
    x_flat = x.reshape(-1, D).astype(jnp.float32)
    scores = x_flat @ w.astype(jnp.float32) + u.astype(jnp.float32)
    attn = jax.nn.softmax(scores, axis=1)
    return (attn * x_flat).reshape(batch_size, time_steps, D).astype(x.dtype)


if __name__ == "__main__":
    key = jax.random.PRNGKey(0)
    k_x, k_w, k_u, k_x2 = jax.random.split(key, 4)

    batch_size, time_steps, input_dim = 2, 8, 32

    w = jax.random.normal(k_w, (input_dim, input_dim), dtype=jnp.float32)
    u = jax.random.normal(k_u, (input_dim,), dtype=jnp.float32)
    x = jax.random.normal(k_x, (batch_size, time_steps, input_dim),
                          dtype=jnp.float32)

    out = attention_forward(x, w, u, batch_size, time_steps)
    out = jax.block_until_ready(out)
    ref = _reference(x, w, u, batch_size, time_steps)
    assert out.shape == (batch_size, time_steps, input_dim)
    # approx=True reciprocal -> slightly looser tolerance than the f32 reference.
    assert jnp.allclose(out, ref, atol=1e-2, rtol=1e-2), "mismatch vs reference"

    # Non-divisible row count (exercises the partial-last-block path: 21 rows,
    # tile of 8 -> masked writeback on the tail block, no wrapper padding).
    b2, t2 = 3, 7
    x2 = jax.random.normal(k_x2, (b2, t2, input_dim), dtype=jnp.float32)
    out2 = jax.block_until_ready(attention_forward(x2, w, u, b2, t2))
    ref2 = _reference(x2, w, u, b2, t2)
    assert out2.shape == (b2, t2, input_dim)
    assert jnp.allclose(out2, ref2, atol=1e-2, rtol=1e-2), "mismatch vs reference (tail)"

    print("KERNEL_OK")
</pallas_src>

<mosaic_0001>
module attributes {stable_mosaic.version = 11 : i64} {
  func.func @_attention_kernel(%arg0: i32, %arg1: memref<8x32xf32, #tpu.memory_space<vmem>>, %arg2: memref<32x32xf32, #tpu.memory_space<vmem>>, %arg3: memref<1x32xf32, #tpu.memory_space<vmem>>, %arg4: memref<8x32xf32, #tpu.memory_space<vmem>>) attributes {dimension_semantics = [#tpu.dimension_semantics<parallel>], iteration_bounds = array<i64: 2>, scalar_prefetch = 0 : i64, scratch_operands = 0 : i64, tpu.core_type = #tpu.core_type<tc>, window_params = [{transform_indices = @transform_0, window_bounds = array<i64: 8, 32>}, {pipeline_mode = #tpu.pipeline_mode<synchronous>, transform_indices = @transform_1, window_bounds = array<i64: 32, 32>}, {pipeline_mode = #tpu.pipeline_mode<synchronous>, transform_indices = @transform_2, window_bounds = array<i64: 1, 32>}, {transform_indices = @transform_3, window_bounds = array<i64: 8, 32>}]} {
    %c0 = arith.constant 0 : index
    %c0_0 = arith.constant 0 : index
    %0 = vector.load %arg1[%c0, %c0_0] : memref<8x32xf32, #tpu.memory_space<vmem>>, vector<8x32xf32>
    %c0_1 = arith.constant 0 : index
    %c0_2 = arith.constant 0 : index
    %1 = vector.load %arg2[%c0_1, %c0_2] : memref<32x32xf32, #tpu.memory_space<vmem>>, vector<32x32xf32>
    %cst = arith.constant dense<0.000000e+00> : vector<8x32xf32>
    %2 = tpu.matmul %0, %1, %cst {dimension_numbers = #tpu.dot_dimension_numbers<[1], [0], [0], [1], [0, 0, 1, 1], [], []>} : vector<8x32xf32>, vector<32x32xf32>, vector<8x32xf32> -> vector<8x32xf32>
    %c0_3 = arith.constant 0 : index
    %c0_4 = arith.constant 0 : index
    %3 = vector.load %arg3[%c0_3, %c0_4] : memref<1x32xf32, #tpu.memory_space<vmem>>, vector<1x32xf32>
    %4 = vector.broadcast %3 : vector<1x32xf32> to vector<8x32xf32>
    %5 = arith.addf %2, %4 : vector<8x32xf32>
    %cst_5 = arith.constant dense<0xFF800000> : vector<8xf32>
    %6 = vector.multi_reduction <maximumf>, %5, %cst_5 [1] : vector<8x32xf32> to vector<8xf32>
    %7 = vector.shape_cast %6 : vector<8xf32> to vector<8x1xf32>
    %8 = vector.broadcast %7 : vector<8x1xf32> to vector<8x32xf32>
    %9 = arith.subf %5, %8 : vector<8x32xf32>
    %10 = math.exp %9 : vector<8x32xf32>
    %cst_6 = arith.constant dense<0.000000e+00> : vector<8xf32>
    %11 = vector.multi_reduction <add>, %10, %cst_6 [1] : vector<8x32xf32> to vector<8xf32>
    %12 = vector.shape_cast %11 : vector<8xf32> to vector<8x1xf32>
    %13 = tpu.reciprocal %12 {approx = true} : vector<8x1xf32> -> vector<8x1xf32>
    %14 = vector.broadcast %13 : vector<8x1xf32> to vector<8x32xf32>
    %15 = arith.mulf %10, %14 : vector<8x32xf32>
    %16 = arith.mulf %15, %0 : vector<8x32xf32>
    %c0_7 = arith.constant 0 : index
    %c0_8 = arith.constant 0 : index
    %17 = vector.load %arg4[%c0_7, %c0_8] : memref<8x32xf32, #tpu.memory_space<vmem>>, vector<8x32xf32>
    tpu.vector_store %arg4[%c0_7, %c0_8], %16 {strides = array<i32>} : memref<8x32xf32, #tpu.memory_space<vmem>>, vector<8x32xf32>,
    return
  }
  func.func @transform_0(%arg0: i32) -> (i32, i32) {
    %c0_i32 = arith.constant 0 : i32
    %c0_i32_0 = arith.constant 0 : i32
    return %arg0, %c0_i32 : i32, i32
  }
  func.func @transform_1(%arg0: i32) -> (i32, i32) {
    %c0_i32 = arith.constant 0 : i32
    %c0_i32_0 = arith.constant 0 : i32
    %c0_i32_1 = arith.constant 0 : i32
    return %c0_i32, %c0_i32_0 : i32, i32
  }
  func.func @transform_2(%arg0: i32) -> (i32, i32) {
    %c0_i32 = arith.constant 0 : i32
    %c0_i32_0 = arith.constant 0 : i32
    %c0_i32_1 = arith.constant 0 : i32
    return %c0_i32, %c0_i32_0 : i32, i32
  }
  func.func @transform_3(%arg0: i32) -> (i32, i32) {
    %c0_i32 = arith.constant 0 : i32
    %c0_i32_0 = arith.constant 0 : i32
    return %arg0, %c0_i32 : i32, i32
  }
}

</mosaic_0001>

<bundles_post_ra>
// kernel: tpu_custom_call.1
= control target key start
LH: loop header
LB: loop body
LE: loop exit
PB: predicated region body
PF: predicated region fallthrough
CT: control target
= control target key end

     0   :  { %8 = vsyncpa [#allocation3], 0  ;;  %s863_s0 = inlined_call_operand.hbm [shape: f32[16,32], index: 0, kind: input, shape index: {}]   ;;  %s864_s1 = inlined_call_operand.hbm [shape: f32[32,32], index: 1, kind: input, shape index: {}]   ;;  %s865_s2 = inlined_call_operand.vmem [shape: f32[1,32], index: 2, kind: input, shape index: {}]   ;;  %s866_s3 = inlined_call_operand.hbm [shape: f32[16,32], index: 3, kind: output, shape index: {}]  }
   0x1   :  { %10 = vsyncpa [#allocation3 + $0x1], 0 }
   0x2   :  { %11 = vsyncpa [#allocation6], 0 }
   0x3   :  { %12 = vsyncpa [#allocation4], 0 }
   0x4   :  { %14 = vsyncpa [#allocation4 + $0x1], 0  ;;  %s656_s12 = smov 0   ;;  %s658_s13 = smov 0  }
   0x5   :  { %s660_s14 = smov 0   ;;  %s662_s15 = smov 0  }
   0x6 LB: > { %s677_s16 = sadd.s32 4294967295, %s626_s15   ;;  %s394_s17 = sadd.s32 4294967294, %s626_s15   ;;  %s626_s15 = sphi %s662_s15, %s886_s15   ;;  %s622_s14 = sphi %s660_s14, %s885_s14   ;;  %s618_s13 = sphi %s658_s13, %s884_s13   ;;  %s614_s12 = sphi %s656_s12, %s883_s12  }
   0x7   : > { %p40_p0 = scmp.ne.s32.totalorder %s618_s13, %s614_s12  ;;  %p867_p1 = scmp.eq.s32.totalorder %s677_s16, 0 }
   0x8   : > { %p112_p3 = scmp.eq.s32.totalorder %s394_s17, 1  ;;  %p395_p5 = scmp.ge.s32.totalorder %s626_s15, 1 }
   0x9   : > { %p686_p4 = por %p867_p1, %p40_p0  ;;  %p119_p7 = scmp.lt.s32.totalorder %s626_s15, 3 }
   0xa   : > { %p691_p6 = por %p112_p3, %p40_p0  ;;  %s628_s21 = smov [#allocation5]  }
   0xb   : > { %s870_s18 = scalar_select %p686_p4, 1, 0 }
   0xc   : > { %s871_s19 = scalar_select %p691_p6, 1, 0 }
   0xd   : > { %p696_p8 = pnand %p395_p5, %p119_p7  ;;  %s131_s22 = sshll.u32 %s628_s21, 4  ;;  %s700_s22 = int_to_ptr.vmem [resolvable:$true] %s131_s22 }
   0xe   : > { %s712_s24 = sadd.s32 1, %s626_s15   ;;  %s27_s25 = sadd.s32 1, %s622_s14 }
   0xf   : > { %s872_s20 = scalar_select %p696_p8, 1, 0 }
  0x10   : > { %p440_p9 = pneg %p696_p8  ;;  %s24_s26 = ssub.s32 %s626_s15, %s712_s24 }
  0x11   : > { %s498_s29 = scalar_lea.hbm %s864_s1, 512 }
  0x12   : > { %p707_p11 = pnand %p440_p9, %p867_p1  ;;  %p499_p12 = scmp.ne.s32.totalorder %s864_s1, %s498_s29 }
  0x13   : > { %p505_p5 = scmp.lt.u32.totalorder %s498_s29, %s864_s1 }
  0x14   : > { %p500_p13 = pneg %p707_p11 }
  0x16   : > { %p501_p0 = pnand %p500_p13, %p499_p12 }
  0x18   : > { %p502_p3 = pneg %p501_p0 }
  0x1a   : > { %p507_p7 = pnand %p505_p5, %p502_p3 }
  0x1c   : > { %510 = shalt.err (!%p507_p7)
}
  0x1d   : > { %s511_s7 = scalar_lea.vmem %s700_s22, 512  ;;  %p519_p2 = scmp.lt.s32.totalorder %s700_s22, %s700_s22 }
  0x1e   : > { %p512_p9 = scmp.ne.s32.totalorder %s700_s22, %s511_s7  ;;  %p520_p6 = scmp.lt.s32.totalorder %s511_s7, %s511_s7 }
  0x20   : > { %p514_p10 = pnand %p512_p9, %p500_p13  ;;  %p521_p4 = por %p520_p6, %p519_p2 }
  0x22   : > { %p515_p1 = pneg %p514_p10 }
  0x24   : > { %p522_p8 = pnand %p521_p4, %p515_p1 }
  0x26   : > { %525 = shalt.err (!%p522_p8)
}
  0x27   : > { %s629_s8 = smov 128   ;;  %s630_s9 = smov 8  }
  0x28   : > { %443 = dma.hbm_to_vmem [thread:$0]  (!%p707_p11), %s864_s1, 512, %s700_s22, [#allocation6], %s629_s8, %s629_s8, %s630_s9  }
  0x29   : > { %p25_p2 = scmp.eq.s32.totalorder %s24_s26, 0  ;;  %p34_p1 = scmp.ne.s32.totalorder %s622_s14, %s618_s13 }
  0x2a   : > { %p35_p4 = scmp.eq.s32.totalorder %s626_s15, 0  ;;  %p453_p6 = scmp.lt.s32.totalorder %s626_s15, 2 }
  0x2b   : > { %s743_s17 = scalar_select %p25_p2, %s622_s14, %s27_s25  }
  0x2c   : > { %p36_p8 = por %p35_p4, %p34_p1  ;;  %p874_p10 = scmp.eq.s32.totalorder %s677_s16, 1 }
  0x2d   : > { %s148_s27 = sand.u32 1, %s622_s14   ;;  %s399_s28 = sshll.u32 %s626_s15, 7 }
  0x2e   : > { %p747_p12 = por %p874_p10, %p34_p1  ;;  %s398_s29 = sshll.u32 %s148_s27, 3 }
  0x2f   : > { %s756_s4 = scalar_lea.hbm %s863_s0, %s399_s28  ;;  %s152_s22 = scalar_lea.vmem [#allocation2], %s398_s29 }
  0x30   : > { %s159_s25 = sshll.u32 %s152_s22, 4  ;;  %p758_p11 = pnand %p453_p6, %p36_p8  ;;  %s762_s25 = int_to_ptr.vmem [resolvable:$true] %s159_s25 }
  0x31   : > { %s149_s5 = scalar_lea.sflag [#allocation3], %s148_s27  ;;  %s526_s6 = scalar_lea.hbm %s756_s4, 128 }
  0x32   : > { %p527_p13 = scmp.ne.s32.totalorder %s756_s4, %s526_s6  ;;  %p528_p0 = pneg %p758_p11 }
  0x33   : > { %s531_s9 = scalar_lea.hbm %s863_s0, 256  ;;  %p532_p7 = scmp.lt.u32.totalorder %s756_s4, %s863_s0 }
  0x34   : > { %p529_p3 = pnand %p528_p0, %p527_p13  ;;  %p533_p9 = scmp.lt.u32.totalorder %s531_s9, %s526_s6 }
  0x35   : > { %p535_p1 = scmp.lt.u32.totalorder %s526_s6, %s756_s4 }
  0x36   : > { %p530_p5 = pneg %p529_p3  ;;  %p534_p2 = por %p533_p9, %p532_p7 }
  0x38   : > { %p536_p4 = por %p535_p1, %p534_p2 }
  0x3a   : > { %p537_p6 = pnand %p536_p4, %p530_p5 }
  0x3c   : > { %540 = shalt.err (!%p537_p6)
}
  0x3d   : > { %s541_s27 = scalar_lea.vmem %s762_s25, 128  ;;  %s631_s28 = smov [#allocation2]  }
  0x3e   : > { %p542_p8 = scmp.ne.s32.totalorder %s762_s25, %s541_s27  ;;  %s546_s29 = sshll.u32 %s631_s28, 4  ;;  %s547_s29 = int_to_ptr.vmem [resolvable:$false] %s546_s29 }
  0x3f   : > { %s548_s23 = scalar_lea.vmem %s547_s29, 256  ;;  %p549_p3 = scmp.lt.s32.totalorder %s762_s25, %s547_s29 }
  0x40   : > { %p544_p10 = pnand %p542_p8, %p528_p0  ;;  %p550_p7 = scmp.lt.s32.totalorder %s548_s23, %s541_s27 }
  0x42   : > { %p545_p13 = pneg %p544_p10  ;;  %p551_p9 = por %p550_p7, %p549_p3 }
  0x44   : > { %p552_p2 = pnand %p551_p9, %p545_p13 }
  0x46   : > { %555 = shalt.err (!%p552_p2)
}
  0x47   : > { %447 = dma.hbm_to_vmem [thread:$0]  (!%p758_p11), %s756_s4, 128, %s762_s25, %s149_s5  }
  0x48   : > { %p877_p5 = scmp.ne.s32.totalorder %s872_s20, 0 }
  0x49   : > { %s792_s30 = sand.u32 (!%p877_p5), 1, %s618_s13   ;;  %p878_p0 = scmp.ne.s32.totalorder (!%p877_p5), %s870_s18, 0 }
  0x4a   : > { %168 = sbr.rel (%p877_p5) target bundleno = 639 (0x27f), region = 32  ;;  %s401_s22 = sshll.u32 (!%p877_p5), %s792_s30, 3 }
  0x4b   : > { %s171_s6 = scalar_lea.sflag (!%p877_p5), [#allocation3], %s792_s30  ;;  %s174_s7 = scalar_lea.vmem (!%p877_p5), [#allocation2], %s401_s22 }
  0x51   : > { %601 = dma.done.wait (%p878_p0), %s171_s6, 128  }
  0x52   : > { %603 = vsyncadd (%p878_p0), %s171_s6, 4294967168  ;;  %p879_p11 = scmp.eq.s32.totalorder %s677_s16, 0 }
  0x54   : > { %605 = dma.done.wait (%p879_p11), [#allocation6], 512   ;;  %p880_p1 = pmov %p879_p11 }
  0x55   : > { %v632_v0 = vmov 0.0|0.0   ;;  %vm633_vm0 = vmmov 0   ;;  %v634_v1 = vmov 0.0   ;;  %v202_v2 = vld [vmem:[#allocation5] sm:$0xff]  ;;  %v203_v3 = vld [vmem:[#allocation5 + $0x8] sm:$0xff]  ;;  %v204_v4 = vld [vmem:[#allocation5 + $0x10] sm:$0xff] }
  0x56   : > { %607 = vsyncadd (%p880_p1), [#allocation6], 4294966784  ;;  %426 = vmatprep.subr.bf16.mxu0 %v632_v0  ;;  %423 = vmatprep.mubr.msk.f32.mxu0 %vm633_vm0, %v634_v1  ;;  %v427_v5 = vpack.c.bf16 %v203_v3, %v202_v2  ;;  %v205_v6 = vld [vmem:[#allocation5 + $0x18] sm:$0xff]  ;;  %vm213_vm1 = vcmask 261120   ;;  %v404_v9 = vld [vmem:[%s865_s2] ss:$0 sm:$0xff] }
  0x57   : > { %v430_v7 = vpack.c.bf16 %v205_v6, %v204_v4  ;;  %v201_v8 = vld [vmem:[%s174_s7] sm:$0xff]  ;;  %s407_s4 = sshll.u32 %s677_s16, 7  ;;  %s200_s25 = scalar_lea.vmem [#allocation7], %s401_s22 }
  0x58   : > { %428 = vmatpush3.bf16.msra.mxu0 %v427_v5  ;;  %s314_s26 = sshll.u32 %s200_s25, 4  ;;  %s818_s9 = scalar_lea.hbm %s866_s3, %s407_s4  ;;  %s820_s26 = int_to_ptr.vmem [resolvable:$true] %s314_s26 }
  0x59   : > { %429 = vmatprep.subr.bf16.mxu0 %v632_v0  ;;  %s301_s10 = scalar_lea.sflag [#allocation4], %s792_s30  ;;  %s556_s11 = scalar_lea.vmem %s820_s26, 128 }
  0x5a   : > { %p557_p4 = scmp.ne.s32.totalorder %s820_s26, %s556_s11  ;;  %s635_s16 = smov [#allocation7]  }
  0x5b   : > { %s560_s27 = sshll.u32 %s635_s16, 4  ;;  %s561_s27 = int_to_ptr.vmem [resolvable:$false] %s560_s27 }
  0x5c   : > { %431 = vmatpush3.bf16.msra.mxu0 %v430_v7  ;;  %p558_p6 = pnand %p557_p4, %p747_p12  ;;  %s562_s28 = scalar_lea.vmem %s561_s27, 256 }
  0x5d   : > { %p563_p10 = scmp.lt.s32.totalorder %s820_s26, %s561_s27  ;;  %p564_p13 = scmp.lt.s32.totalorder %s562_s28, %s556_s11 }
  0x5e   : > { %p559_p8 = pneg %p558_p6 }
  0x5f   : > { %424 = vmatmul.mubr.msk.f32.vlgmr.msra.gmra.mrb[0].mxu0 %vm213_vm1, %v201_v8  ;;  %p565_p3 = por %p564_p13, %p563_p10 }
  0x61   : > { %p566_p7 = pnand %p565_p3, %p559_p8 }
 0x132   : > { %v283_v10 = vpop.f32.mrb[0].mxu0 }
 0x133   : > { %v284_v11 = vadd.f32 %v404_v9, %v283_v10  ;;  %v425_v12 = vpop.f32.mrb[1].mxu0 }
 0x135   : > { %v287_v13 = vsel %vm213_vm1, %v284_v11, -inf }
 0x136   : > { %288 = vmax.xlane.f32.xlu0 %v287_v13 }
 0x1c3   : > { %v289_v14 = vpop.xlane.xlu0 %288 }
 0x1c4   : > { %v290_v15 = vsub.f32 %v284_v11, %v289_v14 }
 0x1c6   : > { %v291_v16 = vmul.f32 1.442695, %v290_v15 }
 0x1c8   : > { %494 = vpow2.f32 %v291_v16 }
 0x1d2   : > { %v495_v17 = vpop.eup %494 }
 0x1d3   : > { %v293_v18 = vsel %vm213_vm1, %v495_v17, 0.0 }
 0x1d4   : > { %294 = vadd.xlane.f32.xlu0 %v293_v18 }
 0x261   : > { %v295_v19 = vpop.xlane.xlu0 %294 }
 0x262   : > { %496 = vrcp.f32 %v295_v19 }
 0x26c   : > { %v497_v20 = vpop.eup %496 }
 0x26d   : > { %v297_v21 = vmul.f32 %v497_v20, %v495_v17 }
 0x26f   : > { %v298_v22 = vmul.f32 %v297_v21, %v201_v8 }
 0x271   : > { %299 = vst.msk [vmem:[%s200_s25] sm:$0xff] %vm213_vm1, %v298_v22 }
 0x272   : > { %569 = shalt.err (!%p566_p7)
}
 0x273   : > { %s570_s29 = scalar_lea.hbm %s818_s9, 128  ;;  %s574_s22 = scalar_lea.hbm %s866_s3, 256 }
 0x274   : > { %p571_p9 = scmp.ne.s32.totalorder %s818_s9, %s570_s29  ;;  %p575_p0 = scmp.lt.u32.totalorder %s818_s9, %s866_s3 }
 0x275   : > { %p576_p11 = scmp.lt.u32.totalorder %s574_s22, %s570_s29  ;;  %p578_p4 = scmp.lt.u32.totalorder %s570_s29, %s818_s9 }
 0x276   : > { %p572_p2 = pnand %p571_p9, %p747_p12 }
 0x277   : > { %p577_p1 = por %p576_p11, %p575_p0 }
 0x278   : > { %p573_p5 = pneg %p572_p2 }
 0x279   : > { %p579_p6 = por %p578_p4, %p577_p1 }
 0x27b   : > { %p580_p8 = pnand %p579_p6, %p573_p5 }
 0x27d   : > { %583 = shalt.err (!%p580_p8)
}
 0x27e   : > { %438 = dma.vmem_to_hbm [thread:$0]  (%p747_p12), %s820_s26, 128, %s818_s9, %s301_s10  }
 0x27f PF: > { %s326_s18 = sand.u32 1, %s614_s12   ;;  %p881_p10 = scmp.ne.s32.totalorder %s871_s19, 0 }
 0x280   : > { %p882_p13 = scmp.ge.s32.totalorder %s626_s15, 2  ;;  %s327_s20 = scalar_lea.sflag [#allocation4], %s326_s18 }
 0x282   : > { %p449_p3 = pnand %p882_p13, %p881_p10 }
 0x284   : > { %609 = dma.done.wait (!%p449_p3), %s327_s20, 128  }
 0x285   : > { %611 = vsyncadd (!%p449_p3), %s327_s20, 4294967168  ;;  %p17_p7 = scmp.ge.s32.totalorder %s712_s24, 4   ;;  %s883_s12 = smov %s618_s13 }
 0x286   : > { %s884_s13 = smov %s622_s14  ;;  %s885_s14 = smov %s743_s17 }
 0x287   : > { %s886_s15 = smov %s712_s24  ;;  %19 = sbr.rel (!%p17_p7) target bundleno = 6 (0x6), region = 81 }
 0x28e   :  { %332 = vsyncpa [#allocation3], 1 }
 0x28f   :  { %334 = vsyncpa [#allocation3 + $0x1], 1 }
 0x290   :  { %335 = vsyncpa [#allocation6], 1 }
 0x291   :  { %336 = vsyncpa [#allocation4], 1 }
 0x292   :  { %338 = vsyncpa [#allocation4 + $0x1], 1 }

</bundles_post_ra>
